<compile_context>
chip_gen: v7x
topology: tpu7x:2x2x1
jax: 0.10.0
libtpu: 0.0.40
codegen_flags: <defaults>
</compile_context>

<pallas_src>
import functools

import jax
import jax.numpy as jnp
from jax import lax
from jax.experimental import pallas as pl
from jax.experimental.pallas import tpu as pltpu

_NEG_INF = -1e30      # finite Python-float sentinel (never a jnp array -> not captured)
_LANES = 128


def _round_up(x, m):
    return ((x + m - 1) // m) * m


def _pick_tile(total, cap):
    """Largest multiple of 128 that divides `total` (itself a multiple of 128), <= cap."""
    best = _LANES
    d = _LANES
    while d <= min(total, max(cap, _LANES)):
        if total % d == 0:
            best = d
        d += _LANES
    return best


def _vmem_limit_bytes():
    # ~85% of physical VMEM: ~108 MiB on v5e/v6e (128 MiB), ~54 MiB on v7x (64 MiB).
    try:
        cap = pltpu.get_tpu_info().vmem_capacity_bytes
    except Exception:
        cap = 64 * 1024 * 1024
    return int(cap * 0.85)


# ----------------------------- PPRGoMLP kernel --------------------------------
# MixedLinear -> ReLU -> (Dropout: identity at eval) -> Linear -> ReLU -> Linear.
# Also builds the two augmented bf16 outputs used by the medoid stage:
#   G = [logits, |l|^2, 1]   (contracted against D to give squared distances)
#   D = [-2*logits, 1, |l|^2]
def mlp_kernel(x_ref, w1_ref, w2_ref, w3_ref, g_ref, d_ref):
    bf16, f32 = jnp.bfloat16, jnp.float32
    x = x_ref[...].astype(bf16)
    h = jnp.maximum(jnp.dot(x, w1_ref[...].astype(bf16), preferred_element_type=f32), 0.0)
    h = jnp.maximum(jnp.dot(h.astype(bf16), w2_ref[...].astype(bf16),
                            preferred_element_type=f32), 0.0)
    logits = jnp.dot(h.astype(bf16), w3_ref[...].astype(bf16),
                     preferred_element_type=f32)                 # (tm, 128); cols >= C are 0
    sq = jnp.sum(logits * logits, axis=1, keepdims=True)         # (tm, 1)
    tm, cp = logits.shape
    col = lax.broadcasted_iota(jnp.int32, (tm, cp), 1)
    sq_col = col == cp - 2
    one_col = col == cp - 1
    g = jnp.where(sq_col, sq, jnp.where(one_col, 1.0, logits))
    d = jnp.where(sq_col, 1.0, jnp.where(one_col, sq, -2.0 * logits))
    g_ref[...] = g.astype(g_ref.dtype)
    d_ref[...] = d.astype(d_ref.dtype)


# --------------- soft_weighted_medoid_k_neighborhood kernel -------------------
# Grid = (candidate tiles c [outer], all-node tiles j [inner]).
#   * dist_sc accumulates  dist[i, c] = sum_j A[i, j] * ||l_c - l_j||  over j tiles.
#   * At j == last, a flash-style online softmax over the candidate axis updates
#     (m_sc, l_sc, acc_sc); finalize at the last (c, j).
def medoid_kernel(thr_ref, rowsum_ref, a_c_ref, a_j_ref, g_ref, d_ref, out_ref,
                  dist_sc, m_sc, l_sc, acc_sc,
                  *, inv_temperature, eps, with_weight_correction):
    f32, bf16 = jnp.float32, jnp.bfloat16
    c = pl.program_id(0)
    j = pl.program_id(1)
    nc = pl.num_programs(0)
    nj = pl.num_programs(1)

    @pl.when((c == 0) & (j == 0))
    def _init_softmax_state():
        m_sc[...] = jnp.full_like(m_sc, _NEG_INF)
        l_sc[...] = jnp.zeros_like(l_sc)
        acc_sc[...] = jnp.zeros_like(acc_sc)

    @pl.when(j == 0)
    def _init_dist():
        dist_sc[...] = jnp.zeros_like(dist_sc)

    # d2[j, c] = |l_j|^2 + |l_c|^2 - 2 l_j.l_c via a single augmented gram matmul.
    d2 = lax.dot_general(g_ref[...], d_ref[...], (((1,), (1,)), ((), ())),
                         preferred_element_type=f32)              # (tj, tc)
    l2 = jnp.sqrt(jnp.abs(d2) + eps)
    dist_sc[...] += jnp.dot(a_j_ref[...], l2.astype(bf16), preferred_element_type=f32)

    @pl.when(j == nj - 1)
    def _online_softmax_update():
        a_cols = a_c_ref[...]                                     # (m, tc), f32
        # candidate validity: in the row's top-k (>= per-row threshold) and nonzero.
        # TODO(synk): exact ties at the k-th value admit >k candidates (lax.top_k
        # tie-breaking is not reproduced in-kernel).
        valid = (a_cols >= thr_ref[...]) & (a_cols != 0.0)
        neg = jnp.where(valid, -dist_sc[...] * inv_temperature, _NEG_INF)
        m_new = jnp.maximum(m_sc[...], jnp.max(neg, axis=1, keepdims=True))
        alpha = jnp.exp(m_sc[...] - m_new)
        p = jnp.where(valid, jnp.exp(neg - m_new), 0.0)
        if with_weight_correction:
            p = p * a_cols            # softmax denominator cancels in the final renorm
        l_sc[...] = alpha * l_sc[...] + jnp.sum(p, axis=1, keepdims=True)
        # p @ D: class columns give -2 * (p @ logits); the 2 augmented cols are discarded.
        acc_sc[...] = alpha * acc_sc[...] + jnp.dot(p.astype(bf16), d_ref[...],
                                                    preferred_element_type=f32)
        m_sc[...] = m_new

    @pl.when((c == nc - 1) & (j == nj - 1))
    def _finalize():
        denom = jnp.maximum(l_sc[...], 1e-30)                     # guard all-invalid rows
        out_ref[...] = (rowsum_ref[...] * (-0.5) * acc_sc[...] / denom).astype(out_ref.dtype)


# ------------------------------- wrapper ---------------------------------------
def robust_pprgo_forward(X, W1, W2, W3, ppr, *, k=32, temperature=1.0,
                         with_weight_correction=True,
                         mlp_row_tile=2048, candidate_tile=256, node_tile=1024):
    m, n = ppr.shape
    F = X.shape[1]
    H = W1.shape[1]
    C = W3.shape[1]
    Cp = _LANES
    assert C <= Cp - 2, "need two spare lanes in the 128-padded class dim for the |.|^2 fold"

    if k > n:
        # mirrors RobustPPRGo's "no with_weight_correction" fallback
        with_weight_correction = False
        k_eff = n
    else:
        k_eff = k

    # Per-row k-th-largest ppr value; the kernel reconstructs the top-k set as
    # (A >= thresh) & (A != 0), avoiding a dense (m, n) f32 mask stream.
    vals = jax.lax.top_k(ppr, k_eff)[0]
    thresh = vals[:, k_eff - 1:k_eff]                             # (m, 1)
    row_sum = jnp.sum(ppr, axis=1, keepdims=True)                 # (m, 1)

    n_pad = _round_up(n, _LANES)
    tm = _pick_tile(n_pad, mlp_row_tile)                          # MLP row tile
    tc = _pick_tile(n_pad, candidate_tile)                        # medoid candidate tile
    tj = _pick_tile(n_pad, node_tile)                             # medoid all-node tile

    X_p = jnp.pad(X, ((0, n_pad - n), (0, 0)))
    W3_p = jnp.pad(W3, ((0, 0), (0, Cp - C)))
    A_p = jnp.pad(ppr, ((0, 0), (0, n_pad - n)))
    A_bf = A_p.astype(jnp.bfloat16)                               # bf16 stream for dist matmul

    vmem_limit = _vmem_limit_bytes()

    # ---- stage 1: MLP over row tiles (pipelined, megacore-parallel) ----
    G, D = pl.pallas_call(
        mlp_kernel,
        out_shape=(jax.ShapeDtypeStruct((n_pad, Cp), jnp.bfloat16),
                   jax.ShapeDtypeStruct((n_pad, Cp), jnp.bfloat16)),
        grid=(n_pad // tm,),
        in_specs=[pl.BlockSpec((tm, F), lambda i: (i, 0)),
                  pl.BlockSpec((F, H), lambda i: (0, 0)),
                  pl.BlockSpec((H, H), lambda i: (0, 0)),
                  pl.BlockSpec((H, Cp), lambda i: (0, 0))],
        out_specs=(pl.BlockSpec((tm, Cp), lambda i: (i, 0)),
                   pl.BlockSpec((tm, Cp), lambda i: (i, 0))),
        compiler_params=pltpu.CompilerParams(
            dimension_semantics=("parallel",),
            vmem_limit_bytes=vmem_limit),
    )(X_p, W1, W2, W3_p)

    # ---- stage 2: soft weighted medoid, 2-D tiled (candidates x all-nodes) ----
    # TODO(synk): add a leading "parallel" row-block grid axis (v7x megacore) -- the
    # online-softmax carry is per-row, so row blocks are independent.
    kernel = functools.partial(
        medoid_kernel,
        inv_temperature=float(1.0 / temperature),
        eps=float(100.0 * jnp.finfo(jnp.float32).eps),
        with_weight_correction=bool(with_weight_correction))

    out_p = pl.pallas_call(
        kernel,
        out_shape=jax.ShapeDtypeStruct((m, Cp), jnp.float32),
        grid=(n_pad // tc, n_pad // tj),
        in_specs=[pl.BlockSpec((m, 1), lambda c, j: (0, 0)),      # per-row top-k threshold
                  pl.BlockSpec((m, 1), lambda c, j: (0, 0)),      # per-row sum of ppr
                  pl.BlockSpec((m, tc), lambda c, j: (0, c)),     # A cols (mask path), f32
                  pl.BlockSpec((m, tj), lambda c, j: (0, j)),     # A stream (dist matmul), bf16
                  pl.BlockSpec((tj, Cp), lambda c, j: (j, 0)),    # G = [logits, |l|^2, 1]
                  pl.BlockSpec((tc, Cp), lambda c, j: (c, 0))],   # D = [-2 logits, 1, |l|^2]
        out_specs=pl.BlockSpec((m, Cp), lambda c, j: (0, 0)),     # lane-dense (Cp = 128)
        scratch_shapes=[pltpu.VMEM((m, tc), jnp.float32),         # dist accumulator (over j)
                        pltpu.VMEM((m, 1), jnp.float32),          # running max
                        pltpu.VMEM((m, 1), jnp.float32),          # running sum
                        pltpu.VMEM((m, Cp), jnp.float32)],        # running weighted logits
        compiler_params=pltpu.CompilerParams(
            dimension_semantics=("arbitrary", "arbitrary"),       # carries => sequential
            vmem_limit_bytes=vmem_limit),
    )(thresh, row_sum, A_p, A_bf, G, D)

    return out_p[:, :C]


# ------------------------------- reference -------------------------------------
def reference_forward(X, W1, W2, W3, ppr, *, k, temperature, with_weight_correction):
    """Pure-JAX f32 mirror of the PyTorch dense code path (for validation)."""
    hp = jax.lax.Precision.HIGHEST
    h = jax.nn.relu(jnp.dot(X, W1, precision=hp))
    h = jax.nn.relu(jnp.dot(h, W2, precision=hp))
    logits = jnp.dot(h, W3, precision=hp)

    sq = jnp.sum(logits ** 2, axis=1)
    d2 = sq[:, None] + sq[None, :] - 2.0 * jnp.dot(logits, logits.T, precision=hp)
    l2 = jnp.sqrt(jnp.abs(d2) + 1e2 * jnp.finfo(jnp.float32).eps)

    m, n = ppr.shape
    vals, idx = jax.lax.top_k(ppr, k)
    dist = (ppr[:, None, :] * l2[idx]).sum(-1)                    # (m, k)
    dist = jnp.where(vals == 0, jnp.finfo(jnp.float32).max, dist)
    soft = jax.nn.softmax(-dist / temperature, axis=-1)

    rows = jnp.arange(m)[:, None]
    w_full = jnp.zeros_like(ppr).at[rows, idx].set(soft)
    if with_weight_correction:
        w_full = w_full.at[rows, idx].multiply(vals)
        w_full = w_full / w_full.sum(-1, keepdims=True)
    row_sum = ppr.sum(-1, keepdims=True)
    return row_sum * jnp.dot(w_full, logits, precision=hp)


if __name__ == "__main__":
    # Shapes consistent with the module: num_features=32, hidden_size=32, num_classes=16,
    # nlayers=3, dropout inactive (eval), batch_norm=False, mean='soft_k_medoid' with
    # defaults k=32, temperature=1.0, with_weight_correction=True.
    # n_nodes=320 -> n_pad=384; the small tile caps below force a 3-step MLP grid and a
    # 3x3 medoid grid so the dist-accumulation + online-softmax pipeline is exercised.
    n_nodes, n_feat, hidden, n_cls, batch = 320, 32, 32, 16, 16
    k, temperature = 32, 1.0

    key = jax.random.PRNGKey(0)
    kx, kp, k1, k2, k3 = jax.random.split(key, 5)

    X = jax.random.normal(kx, (n_nodes, n_feat), dtype=jnp.float32)
    u = jax.random.uniform(kp, (batch, n_nodes), dtype=jnp.float32, minval=0.0, maxval=1.0)
    ppr = u / u.sum(axis=1, keepdims=True)          # dense, row-stochastic PPR scores

    W1 = jax.random.normal(k1, (n_feat, hidden), dtype=jnp.float32) / jnp.sqrt(n_feat)
    W2 = jax.random.normal(k2, (hidden, hidden), dtype=jnp.float32) / jnp.sqrt(hidden)
    W3 = jax.random.normal(k3, (hidden, n_cls), dtype=jnp.float32) / jnp.sqrt(hidden)

    out = robust_pprgo_forward(X, W1, W2, W3, ppr, k=k, temperature=temperature,
                               with_weight_correction=True,
                               mlp_row_tile=128, candidate_tile=128, node_tile=128)
    out = jax.block_until_ready(out)

    ref = reference_forward(X, W1, W2, W3, ppr, k=k, temperature=temperature,
                            with_weight_correction=True)

    assert out.shape == (batch, n_cls)
    assert bool(jnp.all(jnp.isfinite(out)))
    # bf16 MXU operands (per perf review) vs. a full-f32 reference -> slightly looser tol.
    assert jnp.allclose(out, ref, rtol=5e-2, atol=1e-1), (
        f"max abs diff = {float(jnp.max(jnp.abs(out - ref)))}")
    print("KERNEL_OK")
</pallas_src>

<mosaic_0001>
module attributes {stable_mosaic.version = 11 : i64} {
  func.func @mlp_kernel(%arg0: i32, %arg1: memref<128x32xf32, #tpu.memory_space<vmem>>, %arg2: memref<32x32xf32, #tpu.memory_space<vmem>>, %arg3: memref<32x32xf32, #tpu.memory_space<vmem>>, %arg4: memref<32x128xf32, #tpu.memory_space<vmem>>, %arg5: memref<128x128xbf16, #tpu.memory_space<vmem>>, %arg6: memref<128x128xbf16, #tpu.memory_space<vmem>>) attributes {dimension_semantics = [#tpu.dimension_semantics<parallel>], iteration_bounds = array<i64: 3>, scalar_prefetch = 0 : i64, scratch_operands = 0 : i64, tpu.core_type = #tpu.core_type<tc>, window_params = [{transform_indices = @transform_0, window_bounds = array<i64: 128, 32>}, {pipeline_mode = #tpu.pipeline_mode<synchronous>, transform_indices = @transform_1, window_bounds = array<i64: 32, 32>}, {pipeline_mode = #tpu.pipeline_mode<synchronous>, transform_indices = @transform_2, window_bounds = array<i64: 32, 32>}, {pipeline_mode = #tpu.pipeline_mode<synchronous>, transform_indices = @transform_3, window_bounds = array<i64: 32, 128>}, {transform_indices = @transform_4, window_bounds = array<i64: 128, 128>}, {transform_indices = @transform_5, window_bounds = array<i64: 128, 128>}]} {
    %c0 = arith.constant 0 : index
    %c0_0 = arith.constant 0 : index
    %0 = vector.load %arg1[%c0, %c0_0] : memref<128x32xf32, #tpu.memory_space<vmem>>, vector<128x32xf32>
    %1 = arith.truncf %0 : vector<128x32xf32> to vector<128x32xbf16>
    %c0_1 = arith.constant 0 : index
    %c0_2 = arith.constant 0 : index
    %2 = vector.load %arg2[%c0_1, %c0_2] : memref<32x32xf32, #tpu.memory_space<vmem>>, vector<32x32xf32>
    %3 = arith.truncf %2 : vector<32x32xf32> to vector<32x32xbf16>
    %cst = arith.constant dense<0.000000e+00> : vector<128x32xf32>
    %4 = tpu.matmul %1, %3, %cst {dimension_numbers = #tpu.dot_dimension_numbers<[1], [0], [0], [1], [0, 0, 1, 1], [], []>} : vector<128x32xbf16>, vector<32x32xbf16>, vector<128x32xf32> -> vector<128x32xf32>
    %cst_3 = arith.constant 0.000000e+00 : f32
    %5 = vector.broadcast %cst_3 : f32 to vector<128x32xf32>
    %6 = arith.maximumf %4, %5 : vector<128x32xf32>
    %7 = arith.truncf %6 : vector<128x32xf32> to vector<128x32xbf16>
    %c0_4 = arith.constant 0 : index
    %c0_5 = arith.constant 0 : index
    %8 = vector.load %arg3[%c0_4, %c0_5] : memref<32x32xf32, #tpu.memory_space<vmem>>, vector<32x32xf32>
    %9 = arith.truncf %8 : vector<32x32xf32> to vector<32x32xbf16>
    %cst_6 = arith.constant dense<0.000000e+00> : vector<128x32xf32>
    %10 = tpu.matmul %7, %9, %cst_6 {dimension_numbers = #tpu.dot_dimension_numbers<[1], [0], [0], [1], [0, 0, 1, 1], [], []>} : vector<128x32xbf16>, vector<32x32xbf16>, vector<128x32xf32> -> vector<128x32xf32>
    %cst_7 = arith.constant 0.000000e+00 : f32
    %11 = vector.broadcast %cst_7 : f32 to vector<128x32xf32>
    %12 = arith.maximumf %10, %11 : vector<128x32xf32>
    %13 = arith.truncf %12 : vector<128x32xf32> to vector<128x32xbf16>
    %c0_8 = arith.constant 0 : index
    %c0_9 = arith.constant 0 : index
    %14 = vector.load %arg4[%c0_8, %c0_9] : memref<32x128xf32, #tpu.memory_space<vmem>>, vector<32x128xf32>
    %15 = arith.truncf %14 : vector<32x128xf32> to vector<32x128xbf16>
    %cst_10 = arith.constant dense<0.000000e+00> : vector<128x128xf32>
    %16 = tpu.matmul %13, %15, %cst_10 {dimension_numbers = #tpu.dot_dimension_numbers<[1], [0], [0], [1], [0, 0, 1, 1], [], []>} : vector<128x32xbf16>, vector<32x128xbf16>, vector<128x128xf32> -> vector<128x128xf32>
    %17 = arith.mulf %16, %16 : vector<128x128xf32>
    %cst_11 = arith.constant dense<0.000000e+00> : vector<128xf32>
    %18 = vector.multi_reduction <add>, %17, %cst_11 [1] : vector<128x128xf32> to vector<128xf32>
    %19 = vector.shape_cast %18 : vector<128xf32> to vector<128x1xf32>
    %20 = tpu.iota {dimensions = array<i32: 1>} : vector<128x128xi32>
    %c126_i32 = arith.constant 126 : i32
    %21 = vector.broadcast %c126_i32 : i32 to vector<128x128xi32>
    %22 = arith.cmpi eq, %20, %21 : vector<128x128xi32>
    %c127_i32 = arith.constant 127 : i32
    %23 = vector.broadcast %c127_i32 : i32 to vector<128x128xi32>
    %24 = arith.cmpi eq, %20, %23 : vector<128x128xi32>
    %cst_12 = arith.constant 1.000000e+00 : f32
    %25 = vector.broadcast %cst_12 : f32 to vector<128x128xf32>
    %26 = arith.select %24, %25, %16 : vector<128x128xi1>, vector<128x128xf32>
    %27 = vector.shape_cast %19 : vector<128x1xf32> to vector<128x1xf32>
    %28 = vector.broadcast %27 : vector<128x1xf32> to vector<128x128xf32>
    %29 = arith.select %22, %28, %26 : vector<128x128xi1>, vector<128x128xf32>
    %cst_13 = arith.constant -2.000000e+00 : f32
    %30 = vector.broadcast %cst_13 : f32 to vector<128x128xf32>
    %31 = arith.mulf %30, %16 : vector<128x128xf32>
    %32 = vector.shape_cast %19 : vector<128x1xf32> to vector<128x1xf32>
    %33 = vector.broadcast %32 : vector<128x1xf32> to vector<128x128xf32>
    %34 = arith.select %24, %33, %31 : vector<128x128xi1>, vector<128x128xf32>
    %cst_14 = arith.constant 1.000000e+00 : f32
    %35 = vector.broadcast %cst_14 : f32 to vector<128x128xf32>
    %36 = arith.select %22, %35, %34 : vector<128x128xi1>, vector<128x128xf32>
    %37 = arith.truncf %29 : vector<128x128xf32> to vector<128x128xbf16>
    %c0_15 = arith.constant 0 : index
    %c0_16 = arith.constant 0 : index
    %38 = vector.load %arg5[%c0_15, %c0_16] : memref<128x128xbf16, #tpu.memory_space<vmem>>, vector<128x128xbf16>
    tpu.vector_store %arg5[%c0_15, %c0_16], %37 {strides = array<i32>} : memref<128x128xbf16, #tpu.memory_space<vmem>>, vector<128x128xbf16>,
    %39 = arith.truncf %36 : vector<128x128xf32> to vector<128x128xbf16>
    %c0_17 = arith.constant 0 : index
    %c0_18 = arith.constant 0 : index
    %40 = vector.load %arg6[%c0_17, %c0_18] : memref<128x128xbf16, #tpu.memory_space<vmem>>, vector<128x128xbf16>
    tpu.vector_store %arg6[%c0_17, %c0_18], %39 {strides = array<i32>} : memref<128x128xbf16, #tpu.memory_space<vmem>>, vector<128x128xbf16>,
    return
  }
  func.func @transform_0(%arg0: i32) -> (i32, i32) {
    %c0_i32 = arith.constant 0 : i32
    %c0_i32_0 = arith.constant 0 : i32
    return %arg0, %c0_i32 : i32, i32
  }
  func.func @transform_1(%arg0: i32) -> (i32, i32) {
    %c0_i32 = arith.constant 0 : i32
    %c0_i32_0 = arith.constant 0 : i32
    %c0_i32_1 = arith.constant 0 : i32
    return %c0_i32, %c0_i32_0 : i32, i32
  }
  func.func @transform_2(%arg0: i32) -> (i32, i32) {
    %c0_i32 = arith.constant 0 : i32
    %c0_i32_0 = arith.constant 0 : i32
    %c0_i32_1 = arith.constant 0 : i32
    return %c0_i32, %c0_i32_0 : i32, i32
  }
  func.func @transform_3(%arg0: i32) -> (i32, i32) {
    %c0_i32 = arith.constant 0 : i32
    %c0_i32_0 = arith.constant 0 : i32
    %c0_i32_1 = arith.constant 0 : i32
    return %c0_i32, %c0_i32_0 : i32, i32
  }
  func.func @transform_4(%arg0: i32) -> (i32, i32) {
    %c0_i32 = arith.constant 0 : i32
    %c0_i32_0 = arith.constant 0 : i32
    return %arg0, %c0_i32 : i32, i32
  }
  func.func @transform_5(%arg0: i32) -> (i32, i32) {
    %c0_i32 = arith.constant 0 : i32
    %c0_i32_0 = arith.constant 0 : i32
    return %arg0, %c0_i32 : i32, i32
  }
}

</mosaic_0001>

<bundles_post_ra>
// kernel: tpu_custom_call.1
= control target key start
LH: loop header
LB: loop body
LE: loop exit
PB: predicated region body
PF: predicated region fallthrough
CT: control target
= control target key end

     0   :  { %11 = vsyncpa [#allocation3], 0  ;;  %s2030_s0 = inlined_call_operand.vmem [shape: f32[384,32], index: 0, kind: input, shape index: {}]   ;;  %s2031_s1 = inlined_call_operand.vmem [shape: f32[32,32], index: 1, kind: input, shape index: {}]   ;;  %s2032_s2 = inlined_call_operand.vmem [shape: f32[32,32], index: 2, kind: input, shape index: {}]   ;;  %s2033_s3 = inlined_call_operand.vmem [shape: f32[32,128], index: 3, kind: input, shape index: {}]   ;;  %s2034_s4 = inlined_call_operand.hbm [shape: bf16[384,128], index: 4, kind: output, shape index: {0}]   ;;  %s2035_s5 = inlined_call_operand.hbm [shape: bf16[384,128], index: 5, kind: output, shape index: {1}]  }
   0x1   :  { %13 = vsyncpa [#allocation3 + $0x1], 0 }
   0x2   :  { %14 = vsyncpa [#allocation5], 0 }
   0x3   :  { %16 = vsyncpa [#allocation5 + $0x1], 0  ;;  %s1584_s18 = smov 0   ;;  %s1586_s19 = smov 0  }
   0x4   :  { %s1588_s20 = smov 0   ;;  %s1590_s21 = smov 0  }
   0x5 LB: > { %s1605_s22 = sadd.s32 4294967295, %s1548_s21   ;;  %s1114_s23 = sadd.s32 4294967294, %s1548_s21   ;;  %s1548_s21 = sphi %s1590_s21, %s2041_s21   ;;  %s1544_s20 = sphi %s1588_s20, %s2040_s20   ;;  %s1540_s19 = sphi %s1586_s19, %s2039_s19   ;;  %s1536_s18 = sphi %s1584_s18, %s2038_s18  }
   0x6   : > { %s1609_s24 = sadd.s32 1, %s1548_s21   ;;  %s118_s25 = sadd.s32 1, %s1544_s20 }
   0x7   : > { %s115_s26 = ssub.s32 %s1548_s21, %s1609_s24  ;;  %p128_p0 = scmp.ne.s32.totalorder %s1544_s20, %s1540_s19 }
   0x8   : > { %p116_p1 = scmp.eq.s32.totalorder %s115_s26, 0  ;;  %p129_p2 = scmp.eq.s32.totalorder %s1605_s22, 2 }
   0x9   : > { %p134_p3 = scmp.ne.s32.totalorder %s1540_s19, %s1536_s18  ;;  %p135_p4 = scmp.eq.s32.totalorder %s1114_s23, 2 }
   0xa   : > { %s1620_s27 = scalar_select %p116_p1, %s1544_s20, %s118_s25  }
   0xb   : > { %p1622_p5 = por %p129_p2, %p128_p0  ;;  %p1626_p6 = por %p135_p4, %p134_p3 }
   0xc   : > { %p1117_p7 = scmp.ge.s32.totalorder %s1548_s21, 1  ;;  %p197_p8 = scmp.lt.s32.totalorder %s1548_s21, 4 }
   0xe   : > { %p198_p9 = pnand %p1117_p7, %p197_p8 }
   0xf   : > { %v263_v0 = vld [vmem:[%s2031_s1] sm:$0xff] (!%p198_p9)  ;;  %v264_v1 = vld [vmem:[%s2031_s1 + $0x8] sm:$0xff] (!%p198_p9)  ;;  %v265_v2 = vld [vmem:[%s2031_s1 + $0x10] sm:$0xff] (!%p198_p9)  ;;  %s1120_s11 = sshll.u32 (!%p198_p9), %s1605_s22, 4  ;;  %vm269_vm0 = vcmask (!%p198_p9), 261120   ;;  %s1218_s6 = sshll.u32 (!%p198_p9), %s1605_s22, 10 }
  0x10   : > { %201 = sbr.rel (%p198_p9) target bundleno = 899 (0x383), region = 36  ;;  %v267_v3 = vpack.c.bf16 (!%p198_p9), %v264_v1, %v263_v0  ;;  %v266_v4 = vld [vmem:[%s2031_s1 + $0x18] sm:$0xff] (!%p198_p9)  ;;  %p231_p10 = scmp.lt.s32.totalorder (!%p198_p9), %s1120_s11, 47  ;;  %v415_v6 = vld [vmem:[%s2032_s2] sm:$0xff] (!%p198_p9)  ;;  %v416_v7 = vld [vmem:[%s2032_s2 + $0x8] sm:$0xff] (!%p198_p9) }
  0x11   : > { %v268_v5 = vpack.c.bf16 (!%p198_p9), %v266_v4, %v265_v2  ;;  %v419_v8 = vpack.c.bf16 (!%p198_p9), %v416_v7, %v415_v6  ;;  %v417_v33 = vld [vmem:[%s2032_s2 + $0x10] sm:$0xff] (!%p198_p9)  ;;  %v418_v34 = vld [vmem:[%s2032_s2 + $0x18] sm:$0xff] (!%p198_p9)  ;;  %v566_v36 = vld [vmem:[%s2033_s3] sm:$0xff] (!%p198_p9)  ;;  %s1942_s10 = scalar_lea.hbm (!%p198_p9), %s2034_s4, %s1218_s6  ;;  %s1953_s13 = scalar_lea.hbm (!%p198_p9), %s2035_s5, %s1218_s6 }
  0x12   : > { %1344 = vmatprep.subr.bf16.mxu0 (!%p198_p9), %v267_v3  ;;  %1404 = vmatprep.subr.bf16.mxu1 (!%p198_p9), %v267_v3  ;;  %v420_v35 = vpack.c.bf16 (!%p198_p9), %v418_v34, %v417_v33  ;;  %v567_v37 = vld [vmem:[%s2033_s3 + $0x8] sm:$0xff] (!%p198_p9)  ;;  %s1550_s16 = smov (!%p198_p9), [#allocation2]  }
  0x13   : > { %1345 = vmatpush3.bf16.msra.mxu0 (!%p198_p9), %v267_v3  ;;  %1406 = vmatpush3.bf16.msra.mxu1 (!%p198_p9), %v267_v3  ;;  %v570_v38 = vpack.c.bf16 (!%p198_p9), %v567_v37, %v566_v36  ;;  %s1458_s17 = sshll.u32 (!%p198_p9), %s1550_s16, 4  ;;  %s1459_s17 = int_to_ptr.vmem [resolvable:$false] %s1458_s17 }
  0x14   : > { %1346 = vmatprep.subr.bf16.mxu0 (!%p198_p9), %v268_v5  ;;  %1405 = vmatprep.subr.bf16.mxu1 (!%p198_p9), %v268_v5 }
  0x17   : > { %s2043_s11 = smov (!%p231_p10, %s1120_s11), 47  ;;  %1347 = vmatpush3.bf16.msra.mxu0 %v268_v5  ;;  %1407 = vmatpush3.bf16.msra.mxu1 %v268_v5 }
  0x18   : > { %s1121_s23 = sshll.u32 %s2043_s11, 3  ;;  %1364 = vmatprep.subr.bf16.mxu1 %v419_v8  ;;  %1384 = vmatprep.subr.bf16.mxu0 %v570_v38 }
  0x19   : > { %s1654_s30 = scalar_lea.vmem %s2030_s0, %s1121_s23  ;;  %s1765_s23 = sand.u32 1, %s1540_s19  }
  0x1a   : > { %v239_v9 = vld [vmem:[%s1654_s30] sm:$0xff]  ;;  %v240_v10 = vld [vmem:[%s1654_s30 + $0x8] sm:$0xff]  ;;  %v241_v11 = vld [vmem:[%s1654_s30 + $0x10] sm:$0xff]  ;;  %s1118_s25 = sshll.u32 %s1765_s23, 6  ;;  %s986_s14 = scalar_lea.sflag [#allocation3], %s1765_s23 }
  0x1b   : > { %v255_v12 = vpack.c.bf16 %v240_v10, %v239_v9  ;;  %v242_v13 = vld [vmem:[%s1654_s30 + $0x18] sm:$0xff]  ;;  %v243_v14 = vld [vmem:[%s1654_s30 + $0x20] sm:$0xff]  ;;  %v244_v15 = vld [vmem:[%s1654_s30 + $0x28] sm:$0xff]  ;;  %s1803_s26 = scalar_lea.vmem [#allocation2], %s1118_s25 }
  0x1c   : > { %v256_v16 = vpack.c.bf16 %v242_v13, %v241_v11  ;;  %v257_v17 = vpack.c.bf16 %v244_v15, %v243_v14  ;;  %v247_v18 = vld [vmem:[%s1654_s30 + $0x40] sm:$0xff]  ;;  %v248_v19 = vld [vmem:[%s1654_s30 + $0x48] sm:$0xff]  ;;  %v249_v20 = vld [vmem:[%s1654_s30 + $0x50] sm:$0xff]  ;;  %s1004_s7 = sshll.u32 %s1803_s26, 4  ;;  %s1944_s7 = int_to_ptr.vmem [resolvable:$true] %s1004_s7 }
  0x1d   : > { %1348 = vmatprep.mubr.msk.bf16.mxu0 %vm269_vm0, %v255_v12  ;;  %v250_v21 = vld [vmem:[%s1654_s30 + $0x58] sm:$0xff]  ;;  %v259_v22 = vpack.c.bf16 %v248_v19, %v247_v18  ;;  %v251_v24 = vld [vmem:[%s1654_s30 + $0x60] sm:$0xff]  ;;  %v252_v25 = vld [vmem:[%s1654_s30 + $0x68] sm:$0xff]  ;;  %s1454_s15 = scalar_lea.vmem %s1944_s7, 1024  ;;  %p1461_p0 = scmp.lt.s32.totalorder %s1944_s7, %s1459_s17 }
  0x1e   : > { %1349 = vmatmul.mubr.msk.bf16.vlgmr.msra.gmra.mrb[0].mxu0 %vm269_vm0, %v256_v16  ;;  %v260_v23 = vpack.c.bf16 %v250_v21, %v249_v20  ;;  %v245_v26 = vld [vmem:[%s1654_s30 + $0x30] sm:$0xff]  ;;  %v246_v27 = vld [vmem:[%s1654_s30 + $0x38] sm:$0xff]  ;;  %v261_v28 = vpack.c.bf16 %v252_v25, %v251_v24  ;;  %p1455_p11 = scmp.ne.s32.totalorder %s1944_s7, %s1454_s15 }
  0x1f   : > { %1352 = vmatprep.mubr.msk.bf16.mxu0 %vm269_vm0, %v257_v17  ;;  %1356 = vmatprep.mubr.msk.bf16.mxu1 %vm269_vm0, %v259_v22  ;;  %v258_v29 = vpack.c.bf16 %v246_v27, %v245_v26  ;;  %v253_v30 = vld [vmem:[%s1654_s30 + $0x70] sm:$0xff]  ;;  %v254_v31 = vld [vmem:[%s1654_s30 + $0x78] sm:$0xff]  ;;  %s1810_s30 = scalar_lea.vmem [#allocation4], %s1118_s25  ;;  %s1460_s25 = scalar_lea.vmem %s1459_s17, 2048 }
  0x20   : > { %1357 = vmatmul.mubr.msk.bf16.vlgmr.msra.gmra.mrb[0].mxu1 %vm269_vm0, %v260_v23  ;;  %v262_v32 = vpack.c.bf16 %v254_v31, %v253_v30  ;;  %1385 = vmatpush3.bf16.msra.mxu0 %v570_v38  ;;  %v568_v15 = vld [vmem:[%s2033_s3 + $0x10] sm:$0xff]  ;;  %v569_v16 = vld [vmem:[%s2033_s3 + $0x18] sm:$0xff]  ;;  %s1020_s22 = sshll.u32 %s1810_s30, 4  ;;  %p1456_p12 = pnand %p1455_p11, %p1622_p5  ;;  %s1955_s22 = int_to_ptr.vmem [resolvable:$true] %s1020_s22 }
  0x21   : > { %1360 = vmatprep.mubr.msk.bf16.mxu1 %vm269_vm0, %v261_v28  ;;  %1365 = vmatpush3.bf16.msra.mxu1 %v419_v8  ;;  %v571_v17 = vpack.c.bf16 %v569_v16, %v568_v15  ;;  %p1462_p1 = scmp.lt.s32.totalorder %s1460_s25, %s1454_s15 }
  0x22   : > { %1366 = vmatprep.subr.bf16.mxu1 %v420_v35  ;;  %p1457_p13 = pneg %p1456_p12 }
  0x23   : > { %1386 = vmatprep.subr.bf16.mxu0 %v571_v17  ;;  %p1463_p2 = por %p1462_p1, %p1461_p0 }
  0x24   : > { %1387 = vmatpush3.bf16.msra.mxu0 %v571_v17 }
  0x25   : > { %1367 = vmatpush3.bf16.msra.mxu1 %v420_v35  ;;  %p1464_p3 = pnand %p1463_p2, %p1457_p13 }
  0x26   : > { %1353 = vmatmul.mubr.msk.bf16.gmra.mrb[4].mxu0 %vm269_vm0, %v258_v29 }
  0x28   : > { %1361 = vmatmul.mubr.msk.bf16.gmra.mrb[4].mxu1 %vm269_vm0, %v262_v32 }
  0xf1   : > { %v1350_v39 = vpop.f32.mrb[0].mxu0 }
  0xf2   : > { %v328_v40 = vpop.f32.mrb[1].mxu0  ;;  %v393_v42 = vmax.f32 %v1350_v39, 0.0 }
  0xf3   : > { %v1351_v41 = vpop.f32.mrb[2].mxu0  ;;  %v1358_v45 = vpop.f32.mrb[0].mxu1  ;;  %v391_v46 = vmax.f32 %v328_v40, 0.0 }
  0xf4   : > { %v394_v43 = vmax.f32 %v1351_v41, 0.0  ;;  %v331_v44 = vpop.f32.mrb[3].mxu0  ;;  %v401_v48 = vmax.f32 %v1358_v45, 0.0  ;;  %v360_v49 = vpop.f32.mrb[1].mxu1 }
  0xf5   : > { %v392_v47 = vmax.f32 %v331_v44, 0.0  ;;  %v399_v51 = vmax.f32 %v360_v49, 0.0  ;;  %v1359_v52 = vpop.f32.mrb[2].mxu1 }
  0xf6   : > { %v408_v50 = vpack.c.bf16 %v394_v43, %v393_v42  ;;  %v402_v54 = vmax.f32 %v1359_v52, 0.0  ;;  %v363_v55 = vpop.f32.mrb[3].mxu1 }
  0xf7   : > { %v407_v53 = vpack.c.bf16 %v392_v47, %v391_v46  ;;  %v400_v56 = vmax.f32 %v363_v55, 0.0 }
  0xf8   : > { %v412_v58 = vpack.c.bf16 %v402_v54, %v401_v48 }
  0xf9   : > { %v1354_v57 = vpop.f32.mrb[4].mxu0  ;;  %1368 = vmatprep.mubr.msk.bf16.mxu1 %vm269_vm0, %v407_v53  ;;  %v411_v60 = vpack.c.bf16 %v400_v56, %v399_v51 }
  0xfa   : > { %v344_v59 = vpop.f32.mrb[5].mxu0  ;;  %1369 = vmatmul.mubr.msk.bf16.vlgmr.msra.gmra.mrb[8].mxu1 %vm269_vm0, %v408_v50  ;;  %v397_v62 = vmax.f32 %v1354_v57, 0.0 }
  0xfb   : > { %v1355_v61 = vpop.f32.mrb[6].mxu0  ;;  %v1362_v1 = vpop.f32.mrb[4].mxu1  ;;  %v395_v2 = vmax.f32 %v344_v59, 0.0 }
  0xfc   : > { %v398_v63 = vmax.f32 %v1355_v61, 0.0  ;;  %v347_v0 = vpop.f32.mrb[7].mxu0  ;;  %v405_v4 = vmax.f32 %v1362_v1, 0.0  ;;  %v376_v5 = vpop.f32.mrb[5].mxu1 }
  0xfd   : > { %v396_v3 = vmax.f32 %v347_v0, 0.0  ;;  %v403_v7 = vmax.f32 %v376_v5, 0.0  ;;  %v1363_v8 = vpop.f32.mrb[6].mxu1 }
  0xfe   : > { %v410_v6 = vpack.c.bf16 %v398_v63, %v397_v62  ;;  %v406_v10 = vmax.f32 %v1363_v8, 0.0  ;;  %v379_v11 = vpop.f32.mrb[7].mxu1 }
  0xff   : > { %v409_v9 = vpack.c.bf16 %v396_v3, %v395_v2  ;;  %v404_v12 = vmax.f32 %v379_v11, 0.0 }
 0x100   : > { %v414_v13 = vpack.c.bf16 %v406_v10, %v405_v4 }
 0x101   : > { %1372 = vmatprep.mubr.msk.bf16.mxu1 %vm269_vm0, %v409_v9  ;;  %v413_v14 = vpack.c.bf16 %v404_v12, %v403_v7 }
 0x102   : > { %1373 = vmatmul.mubr.msk.bf16.gmra.mrb[12].mxu1 %vm269_vm0, %v410_v6 }
 0x103   : > { %1376 = vmatprep.mubr.msk.bf16.mxu1 %vm269_vm0, %v411_v60 }
 0x10a   : > { %1377 = vmatmul.mubr.msk.bf16.gmra.mrb[16].mxu1 %vm269_vm0, %v412_v58 }
 0x10b   : > { %1380 = vmatprep.mubr.msk.bf16.mxu1 %vm269_vm0, %v413_v14 }
 0x112   : > { %1381 = vmatmul.mubr.msk.bf16.gmra.mrb[20].mxu1 %vm269_vm0, %v414_v13 }
 0x1cd   : > { %v1370_v18 = vpop.f32.mrb[8].mxu1 }
 0x1ce   : > { %v479_v19 = vpop.f32.mrb[9].mxu1  ;;  %v544_v21 = vmax.f32 %v1370_v18, 0.0 }
 0x1cf   : > { %v1371_v20 = vpop.f32.mrb[10].mxu1  ;;  %v542_v24 = vmax.f32 %v479_v19, 0.0 }
 0x1d0   : > { %v545_v22 = vmax.f32 %v1371_v20, 0.0  ;;  %v482_v23 = vpop.f32.mrb[11].mxu1 }
 0x1d1   : > { %v543_v25 = vmax.f32 %v482_v23, 0.0 }
 0x1d2   : > { %v559_v26 = vpack.c.bf16 %v545_v22, %v544_v21 }
 0x1d3   : > { %v558_v27 = vpack.c.bf16 %v543_v25, %v542_v24 }
 0x1d5   : > { %v1374_v28 = vpop.f32.mrb[12].mxu1  ;;  %1388 = vmatprep.mubr.msk.bf16.mxu0 %vm269_vm0, %v558_v27 }
 0x1d6   : > { %v495_v29 = vpop.f32.mrb[13].mxu1  ;;  %1389 = vmatmul.mubr.msk.bf16.vlgmr.msra.gmra.mrb[8].mxu0 %vm269_vm0, %v559_v26  ;;  %v548_v31 = vmax.f32 %v1374_v28, 0.0  ;;  %v741_v26 = vlaneseq }
 0x1d7   : > { %v1375_v30 = vpop.f32.mrb[14].mxu1  ;;  %v546_v34 = vmax.f32 %v495_v29, 0.0 }
 0x1d8   : > { %v549_v32 = vmax.f32 %v1375_v30, 0.0  ;;  %v498_v33 = vpop.f32.mrb[15].mxu1  ;;  %v1762_v27 = vand.u32 127, %v741_v26 }
 0x1d9   : > { %v547_v35 = vmax.f32 %v498_v33, 0.0 }
 0x1da   : > { %v561_v36 = vpack.c.bf16 %v549_v32, %v548_v31  ;;  %vm744_vm1 = vcmp.eq.s32.totalorder %v1762_v27, 127  ;;  %vm743_vm2 = vcmp.eq.s32.totalorder %v1762_v27, 126 }
 0x1db   : > { %v560_v37 = vpack.c.bf16 %v547_v35, %v546_v34 }
 0x1dd   : > { %v1378_v38 = vpop.f32.mrb[16].mxu1  ;;  %1392 = vmatprep.mubr.msk.bf16.mxu0 %vm269_vm0, %v560_v37 }
 0x1de   : > { %v511_v39 = vpop.f32.mrb[17].mxu1  ;;  %1393 = vmatmul.mubr.msk.bf16.gmra.mrb[12].mxu0 %vm269_vm0, %v561_v36  ;;  %v552_v41 = vmax.f32 %v1378_v38, 0.0 }
 0x1df   : > { %v1379_v40 = vpop.f32.mrb[18].mxu1  ;;  %v550_v44 = vmax.f32 %v511_v39, 0.0 }
 0x1e0   : > { %v553_v42 = vmax.f32 %v1379_v40, 0.0  ;;  %v514_v43 = vpop.f32.mrb[19].mxu1 }
 0x1e1   : > { %v551_v45 = vmax.f32 %v514_v43, 0.0 }
 0x1e2   : > { %v563_v46 = vpack.c.bf16 %v553_v42, %v552_v41 }
 0x1e3   : > { %v562_v47 = vpack.c.bf16 %v551_v45, %v550_v44 }
 0x1e5   : > { %v1382_v48 = vpop.f32.mrb[20].mxu1  ;;  %1396 = vmatprep.mubr.msk.bf16.mxu0 %vm269_vm0, %v562_v47 }
 0x1e6   : > { %v527_v49 = vpop.f32.mrb[21].mxu1  ;;  %1397 = vmatmul.mubr.msk.bf16.gmra.mrb[16].mxu0 %vm269_vm0, %v563_v46  ;;  %v556_v51 = vmax.f32 %v1382_v48, 0.0 }
 0x1e7   : > { %v1383_v50 = vpop.f32.mrb[22].mxu1  ;;  %v554_v54 = vmax.f32 %v527_v49, 0.0 }
 0x1e8   : > { %v557_v52 = vmax.f32 %v1383_v50, 0.0  ;;  %v530_v53 = vpop.f32.mrb[23].mxu1 }
 0x1e9   : > { %v555_v55 = vmax.f32 %v530_v53, 0.0 }
 0x1ea   : > { %v565_v56 = vpack.c.bf16 %v557_v52, %v556_v51 }
 0x1eb   : > { %v564_v57 = vpack.c.bf16 %v555_v55, %v554_v54 }
 0x1ed   : > { %1400 = vmatprep.mubr.msk.bf16.mxu0 %vm269_vm0, %v564_v57 }
 0x1ee   : > { %1401 = vmatmul.mubr.msk.bf16.gmra.mrb[20].mxu0 %vm269_vm0, %v565_v56 }
 0x2a9   : > { %v1390_v58 = vpop.f32.mrb[8].mxu0 }
 0x2aa   : > { %v630_v59 = vpop.f32.mrb[9].mxu0  ;;  %v695_v60 = vmul.f32 %v1390_v58, %v1390_v58  ;;  %v779_v28 = vmul.f32 -2.0, %v1390_v58  ;;  %v747_v33 = vsel %vm744_vm1, 1.0, %v1390_v58 }
 0x2ab   : > { %v1391_v61 = vpop.f32.mrb[10].mxu0  ;;  %v693_v62 = vmul.f32 %v630_v59, %v630_v59  ;;  %v777_v31 = vmul.f32 -2.0, %v630_v59  ;;  %v745_v34 = vsel %vm744_vm1, 1.0, %v630_v59 }
 0x2ac   : > { %713 = vadd.xlane.f32.xlu1 %v695_v60  ;;  %v633_v63 = vpop.f32.mrb[11].mxu0  ;;  %v696_v0 = vmul.f32 %v1391_v61, %v1391_v61  ;;  %v748_v35 = vsel %vm744_vm1, 1.0, %v1391_v61  ;;  %v780_v36 = vmul.f32 -2.0, %v1391_v61 }
 0x2ad   : > { %709 = vadd.xlane.f32.xlu0 %v693_v62  ;;  %v694_v1 = vmul.f32 %v633_v63, %v633_v63  ;;  %v746_v37 = vsel %vm744_vm1, 1.0, %v633_v63  ;;  %v778_v38 = vmul.f32 -2.0, %v633_v63 }
 0x2b0   : > { %715 = vadd.xlane.f32.xlu1 %v696_v0 }
 0x2b1   : > { %711 = vadd.xlane.f32.xlu0 %v694_v1  ;;  %v1714_v2 = vpop.f32.mrb[12].mxu0 }
 0x2b2   : > { %v1716_v3 = vpop.f32.mrb[13].mxu0  ;;  %v699_v4 = vmul.f32 %v1714_v2, %v1714_v2  ;;  %v783_v55 = vmul.f32 -2.0, %v1714_v2  ;;  %v751_v57 = vsel %vm744_vm1, 1.0, %v1714_v2 }
 0x2b3   : > { %v1720_v5 = vpop.f32.mrb[14].mxu0  ;;  %v697_v8 = vmul.f32 %v1716_v3, %v1716_v3 }
 0x2b4   : > { %v1722_v6 = vpop.f32.mrb[15].mxu0  ;;  %v700_v7 = vmul.f32 %v1720_v5, %v1720_v5  ;;  %v784_v58 = vmul.f32 -2.0, %v1720_v5  ;;  %v752_v60 = vsel %vm744_vm1, 1.0, %v1720_v5 }
 0x2b5   : > { %721 = vadd.xlane.f32.xlu0 %v699_v4  ;;  %v698_v9 = vmul.f32 %v1722_v6, %v1722_v6  ;;  %v781_v4 = vmul.f32 -2.0, %v1716_v3 }
 0x2b6   : > { %723 = vadd.xlane.f32.xlu1 %v700_v7 }
 0x2b9   : > { %717 = vadd.xlane.f32.xlu0 %v697_v8  ;;  %v1730_v10 = vpop.f32.mrb[16].mxu0  ;;  %v749_v8 = vsel %vm744_vm1, 1.0, %v1716_v3 }
 0x2ba   : > { %719 = vadd.xlane.f32.xlu1 %v698_v9  ;;  %v1732_v11 = vpop.f32.mrb[17].mxu0  ;;  %v703_v12 = vmul.f32 %v1730_v10, %v1730_v10  ;;  %v782_v9 = vmul.f32 -2.0, %v1722_v6 }
 0x2bb   : > { %v1736_v13 = vpop.f32.mrb[18].mxu0  ;;  %v701_v16 = vmul.f32 %v1732_v11, %v1732_v11 }
 0x2bc   : > { %v1738_v14 = vpop.f32.mrb[19].mxu0  ;;  %v704_v15 = vmul.f32 %v1736_v13, %v1736_v13 }
 0x2bd   : > { %729 = vadd.xlane.f32.xlu0 %v703_v12  ;;  %v702_v17 = vmul.f32 %v1738_v14, %v1738_v14 }
 0x2be   : > { %731 = vadd.xlane.f32.xlu1 %v704_v15 }
 0x2c1   : > { %725 = vadd.xlane.f32.xlu0 %v701_v16  ;;  %v1746_v18 = vpop.f32.mrb[20].mxu0  ;;  %v750_v16 = vsel %vm744_vm1, 1.0, %v1722_v6 }
 0x2c2   : > { %727 = vadd.xlane.f32.xlu1 %v702_v17  ;;  %v1748_v19 = vpop.f32.mrb[21].mxu0  ;;  %v707_v24 = vmul.f32 %v1746_v18, %v1746_v18 }
 0x2c3   : > { %v1750_v20 = vpop.f32.mrb[22].mxu0  ;;  %v705_v21 = vmul.f32 %v1748_v19, %v1748_v19 }
 0x2c4   : > { %v1754_v22 = vpop.f32.mrb[23].mxu0  ;;  %v708_v25 = vmul.f32 %v1750_v20, %v1750_v20 }
 0x2c5   : > { %733 = vadd.xlane.f32.xlu0 %v705_v21  ;;  %v706_v23 = vmul.f32 %v1754_v22, %v1754_v22 }
 0x2c7   : > { %735 = vadd.xlane.f32.xlu1 %v706_v23 }
 0x2c9   : > { %737 = vadd.xlane.f32.xlu0 %v707_v24 }
 0x2cb   : > { %739 = vadd.xlane.f32.xlu1 %v708_v25  ;;  %v787_v25 = vmul.f32 -2.0, %v1730_v10 }
 0x339   : > { %v714_v29 = vpop.xlane.xlu1 %713 }
 0x33a   : > { %v710_v30 = vpop.xlane.xlu0 %709  ;;  %v795_v32 = vsel %vm744_vm1, %v714_v29, %v779_v28  ;;  %v763_v39 = vsel %vm743_vm2, %v714_v29, %v747_v33  ;;  %v755_v29 = vsel %vm744_vm1, 1.0, %v1730_v10  ;;  %v756_v33 = vsel %vm744_vm1, 1.0, %v1736_v13 }
 0x33b   : > { %v793_v40 = vsel %vm744_vm1, %v710_v30, %v777_v31  ;;  %v811_v42 = vsel %vm743_vm2, 1.0, %v795_v32  ;;  %v761_v43 = vsel %vm743_vm2, %v710_v30, %v745_v34  ;;  %v788_v30 = vmul.f32 -2.0, %v1736_v13 }
 0x33c   : > { %v809_v51 = vsel %vm743_vm2, 1.0, %v793_v40 }
 0x33d   : > { %v716_v41 = vpop.xlane.xlu1 %715 }
 0x33e   : > { %v764_v44 = vsel %vm743_vm2, %v716_v41, %v748_v35  ;;  %v796_v45 = vsel %vm744_vm1, %v716_v41, %v780_v36  ;;  %v712_v46 = vpop.xlane.xlu0 %711  ;;  %v753_v41 = vsel %vm744_vm1, 1.0, %v1732_v11 }
 0x33f   : > { %v812_v47 = vsel %vm743_vm2, 1.0, %v796_v45  ;;  %v1228_v48 = vpack.c.bf16 %v764_v44, %v763_v39  ;;  %v762_v49 = vsel %vm743_vm2, %v712_v46, %v746_v37  ;;  %v794_v50 = vsel %vm744_vm1, %v712_v46, %v778_v38 }
 0x340   : > { %v1268_v52 = vpack.c.bf16 %v812_v47, %v811_v42  ;;  %v810_v53 = vsel %vm743_vm2, 1.0, %v794_v50  ;;  %v1223_v54 = vpack.c.bf16 %v762_v49, %v761_v43  ;;  %v785_v38 = vmul.f32 -2.0, %v1732_v11 }
 0x341   : > { %1300 = vst [vmem:[%s1803_s26 + $0x8] sm:$0xff] %v1228_v48   ;;  %v1263_v56 = vpack.c.bf16 %v810_v53, %v809_v51  ;;  %v786_v42 = vmul.f32 -2.0, %v1738_v14  ;;  %v754_v45 = vsel %vm744_vm1, 1.0, %v1738_v14  ;;  %v789_v14 = vmul.f32 -2.0, %v1748_v19 }
 0x342   : > { %1307 = vst [vmem:[%s1810_s30 + $0x8] sm:$0xff] %v1268_v52   ;;  %1224 = vst [vmem:[%s1803_s26] sm:$0xff] %v1223_v54   ;;  %v722_v59 = vpop.xlane.xlu0 %721 }
 0x343   : > { %1264 = vst [vmem:[%s1810_s30] sm:$0xff] %v1263_v56   ;;  %v767_v61 = vsel %vm743_vm2, %v722_v59, %v751_v57  ;;  %v799_v62 = vsel %vm744_vm1, %v722_v59, %v783_v55  ;;  %v724_v63 = vpop.xlane.xlu1 %723  ;;  %v790_v55 = vmul.f32 -2.0, %v1754_v22  ;;  %v757_v57 = vsel %vm744_vm1, 1.0, %v1748_v19 }
 0x344   : > { %v815_v0 = vsel %vm743_vm2, 1.0, %v799_v62  ;;  %v768_v1 = vsel %vm743_vm2, %v724_v63, %v752_v60  ;;  %v800_v2 = vsel %vm744_vm1, %v724_v63, %v784_v58  ;;  %v758_v58 = vsel %vm744_vm1, 1.0, %v1754_v22 }
 0x345   : > { %v816_v5 = vsel %vm743_vm2, 1.0, %v800_v2  ;;  %v1238_v7 = vpack.c.bf16 %v768_v1, %v767_v61  ;;  %v791_v60 = vmul.f32 -2.0, %v1746_v18  ;;  %v792_v2 = vmul.f32 -2.0, %v1750_v20 }
 0x346   : > { %v1278_v12 = vpack.c.bf16 %v816_v5, %v815_v0  ;;  %v718_v15 = vpop.xlane.xlu0 %717 }
 0x347   : > { %1302 = vst [vmem:[%s1803_s26 + $0x18] sm:$0xff] %v1238_v7   ;;  %v765_v17 = vsel %vm743_vm2, %v718_v15, %v749_v8  ;;  %v797_v21 = vsel %vm744_vm1, %v718_v15, %v781_v4  ;;  %v720_v23 = vpop.xlane.xlu1 %719  ;;  %v759_v7 = vsel %vm744_vm1, 1.0, %v1746_v18  ;;  %v760_v8 = vsel %vm744_vm1, 1.0, %v1750_v20 }
 0x348   : > { %1309 = vst [vmem:[%s1810_s30 + $0x18] sm:$0xff] %v1278_v12   ;;  %v813_v3 = vsel %vm743_vm2, 1.0, %v797_v21  ;;  %v766_v24 = vsel %vm743_vm2, %v720_v23, %v750_v16  ;;  %v798_v6 = vsel %vm744_vm1, %v720_v23, %v782_v9 }
 0x349   : > { %v814_v26 = vsel %vm743_vm2, 1.0, %v798_v6  ;;  %v1233_v28 = vpack.c.bf16 %v766_v24, %v765_v17 }
 0x34a   : > { %v1273_v31 = vpack.c.bf16 %v814_v26, %v813_v3  ;;  %v730_v32 = vpop.xlane.xlu0 %729 }
 0x34b   : > { %1301 = vst [vmem:[%s1803_s26 + $0x10] sm:$0xff] %v1233_v28   ;;  %v771_v34 = vsel %vm743_vm2, %v730_v32, %v755_v29  ;;  %v803_v35 = vsel %vm744_vm1, %v730_v32, %v787_v25  ;;  %v732_v36 = vpop.xlane.xlu1 %731 }
 0x34c   : > { %1308 = vst [vmem:[%s1810_s30 + $0x10] sm:$0xff] %v1273_v31   ;;  %v819_v10 = vsel %vm743_vm2, 1.0, %v803_v35  ;;  %v772_v37 = vsel %vm743_vm2, %v732_v36, %v756_v33  ;;  %v804_v13 = vsel %vm744_vm1, %v732_v36, %v788_v30 }
 0x34d   : > { %v820_v39 = vsel %vm743_vm2, 1.0, %v804_v13  ;;  %v1248_v40 = vpack.c.bf16 %v772_v37, %v771_v34 }
 0x34e   : > { %v1288_v43 = vpack.c.bf16 %v820_v39, %v819_v10  ;;  %v726_v44 = vpop.xlane.xlu0 %725 }
 0x34f   : > { %1304 = vst [vmem:[%s1803_s26 + $0x28] sm:$0xff] %v1248_v40   ;;  %v769_v46 = vsel %vm743_vm2, %v726_v44, %v753_v41  ;;  %v801_v47 = vsel %vm744_vm1, %v726_v44, %v785_v38  ;;  %v728_v48 = vpop.xlane.xlu1 %727 }
 0x350   : > { %1311 = vst [vmem:[%s1810_s30 + $0x28] sm:$0xff] %v1288_v43   ;;  %v817_v11 = vsel %vm743_vm2, 1.0, %v801_v47  ;;  %v770_v49 = vsel %vm743_vm2, %v728_v48, %v754_v45  ;;  %v802_v50 = vsel %vm744_vm1, %v728_v48, %v786_v42 }
 0x351   : > { %v818_v51 = vsel %vm743_vm2, 1.0, %v802_v50  ;;  %v1243_v52 = vpack.c.bf16 %v770_v49, %v769_v46 }
 0x352   : > { %v1283_v53 = vpack.c.bf16 %v818_v51, %v817_v11  ;;  %v734_v54 = vpop.xlane.xlu0 %733 }
 0x353   : > { %1303 = vst [vmem:[%s1803_s26 + $0x20] sm:$0xff] %v1243_v52   ;;  %v805_v56 = vsel %vm744_vm1, %v734_v54, %v789_v14  ;;  %v773_v61 = vsel %vm743_vm2, %v734_v54, %v757_v57 }
 0x354   : > { %1310 = vst [vmem:[%s1810_s30 + $0x20] sm:$0xff] %v1283_v53   ;;  %v736_v59 = vpop.xlane.xlu1 %735  ;;  %v821_v63 = vsel %vm743_vm2, 1.0, %v805_v56 }
 0x355   : > { %v774_v62 = vsel %vm743_vm2, %v736_v59, %v758_v58  ;;  %v806_v19 = vsel %vm744_vm1, %v736_v59, %v790_v55 }
 0x356   : > { %v822_v22 = vsel %vm743_vm2, 1.0, %v806_v19  ;;  %v1253_v0 = vpack.c.bf16 %v774_v62, %v773_v61  ;;  %v738_v1 = vpop.xlane.xlu0 %737 }
 0x357   : > { %v1293_v4 = vpack.c.bf16 %v822_v22, %v821_v63  ;;  %v807_v5 = vsel %vm744_vm1, %v738_v1, %v791_v60  ;;  %v775_v12 = vsel %vm743_vm2, %v738_v1, %v759_v7 }
 0x358   : > { %1305 = vst [vmem:[%s1803_s26 + $0x30] sm:$0xff] %v1253_v0   ;;  %v740_v9 = vpop.xlane.xlu1 %739  ;;  %v823_v20 = vsel %vm743_vm2, 1.0, %v807_v5 }
 0x359   : > { %1312 = vst [vmem:[%s1810_s30 + $0x30] sm:$0xff] %v1293_v4   ;;  %v776_v15 = vsel %vm743_vm2, %v740_v9, %v760_v8  ;;  %v808_v18 = vsel %vm744_vm1, %v740_v9, %v792_v2 }
 0x35a   : > { %v824_v16 = vsel %vm743_vm2, 1.0, %v808_v18  ;;  %v1258_v17 = vpack.c.bf16 %v776_v15, %v775_v12 }
 0x35b   : > { %v1298_v21 = vpack.c.bf16 %v824_v16, %v823_v20 }
 0x35c   : > { %1306 = vst [vmem:[%s1803_s26 + $0x38] sm:$0xff] %v1258_v17  }
 0x35d   : > { %1313 = vst [vmem:[%s1810_s30 + $0x38] sm:$0xff] %v1298_v21  }
 0x35e   : > { %1467 = shalt.err (!%p1464_p3)
}
 0x35f   : > { %s1468_s26 = scalar_lea.hbm %s1942_s10, 1024  ;;  %s1472_s8 = scalar_lea.hbm %s2034_s4, 3072 }
 0x360   : > { %p1469_p4 = scmp.ne.s32.totalorder %s1942_s10, %s1468_s26  ;;  %p1473_p9 = scmp.lt.u32.totalorder %s1942_s10, %s2034_s4 }
 0x361   : > { %p1474_p10 = scmp.lt.u32.totalorder %s1472_s8, %s1468_s26  ;;  %p1476_p12 = scmp.lt.u32.totalorder %s1468_s26, %s1942_s10 }
 0x362   : > { %p1470_p7 = pnand %p1469_p4, %p1622_p5 }
 0x363   : > { %p1475_p11 = por %p1474_p10, %p1473_p9 }
 0x364   : > { %p1471_p8 = pneg %p1470_p7 }
 0x365   : > { %p1477_p13 = por %p1476_p12, %p1475_p11 }
 0x367   : > { %p1478_p0 = pnand %p1477_p13, %p1471_p8 }
 0x369   : > { %1481 = shalt.err (!%p1478_p0)
}
 0x36a   : > { %s1551_s12 = smov 64   ;;  %s1552_s15 = smov 4  }
 0x36b   : > { %1408 = dma.vmem_to_hbm [thread:$0]  (%p1622_p5), %s1944_s7, 1024, %s1942_s10, %s986_s14, %s1551_s12, %s1551_s12, %s1552_s15  }
 0x36c   : > { %s991_s16 = scalar_lea.sflag [#allocation5], %s1765_s23  ;;  %s1482_s17 = scalar_lea.vmem %s1955_s22, 1024 }
 0x36d   : > { %p1483_p1 = scmp.ne.s32.totalorder %s1955_s22, %s1482_s17  ;;  %s1553_s25 = smov [#allocation4]  }
 0x36e   : > { %s1486_s26 = sshll.u32 %s1553_s25, 4  ;;  %s1487_s26 = int_to_ptr.vmem [resolvable:$false] %s1486_s26 }
 0x36f   : > { %p1484_p2 = pnand %p1483_p1, %p1622_p5  ;;  %s1488_s30 = scalar_lea.vmem %s1487_s26, 2048 }
 0x370   : > { %p1489_p4 = scmp.lt.s32.totalorder %s1955_s22, %s1487_s26  ;;  %p1490_p7 = scmp.lt.s32.totalorder %s1488_s30, %s1482_s17 }
 0x371   : > { %p1485_p3 = pneg %p1484_p2 }
 0x372   : > { %p1491_p8 = por %p1490_p7, %p1489_p4 }
 0x374   : > { %p1492_p9 = pnand %p1491_p8, %p1485_p3 }
 0x376   : > { %1495 = shalt.err (!%p1492_p9)
}
 0x377   : > { %s1496_s7 = scalar_lea.hbm %s1953_s13, 1024  ;;  %s1500_s6 = scalar_lea.hbm %s2035_s5, 3072 }
 0x378   : > { %p1497_p10 = scmp.ne.s32.totalorder %s1953_s13, %s1496_s7  ;;  %p1501_p13 = scmp.lt.u32.totalorder %s1953_s13, %s2035_s5 }
 0x379   : > { %p1502_p0 = scmp.lt.u32.totalorder %s1500_s6, %s1496_s7  ;;  %p1504_p2 = scmp.lt.u32.totalorder %s1496_s7, %s1953_s13 }
 0x37a   : > { %p1498_p11 = pnand %p1497_p10, %p1622_p5 }
 0x37b   : > { %p1503_p1 = por %p1502_p0, %p1501_p13 }
 0x37c   : > { %p1499_p12 = pneg %p1498_p11 }
 0x37d   : > { %p1505_p3 = por %p1504_p2, %p1503_p1 }
 0x37f   : > { %p1506_p4 = pnand %p1505_p3, %p1499_p12 }
 0x381   : > { %1509 = shalt.err (!%p1506_p4)
}
 0x382   : > { %1409 = dma.vmem_to_hbm [thread:$0]  (%p1622_p5), %s1955_s22, 1024, %s1953_s13, %s991_s16, %s1551_s12, %s1551_s12, %s1552_s15  }
 0x383 PF: > { %p1419_p7 = scmp.ge.s32.totalorder %s1548_s21, 2  ;;  %s1035_s11 = sand.u32 1, %s1536_s18  }
 0x384   : > { %s1036_s17 = scalar_lea.sflag [#allocation3], %s1035_s11 }
 0x385   : > { %p1413_p8 = pnand %p1419_p7, %p1626_p6 }
 0x387   : > { %1527 = dma.done.wait (!%p1413_p8), %s1036_s17, 1024  }
 0x388   : > { %1529 = vsyncadd (!%p1413_p8), %s1036_s17, 4294966272  ;;  %s1045_s28 = scalar_lea.sflag [#allocation5], %s1035_s11 }
 0x389   : > { %1531 = dma.done.wait (!%p1413_p8), %s1045_s28, 1024  }
 0x38a   : > { %1533 = vsyncadd (!%p1413_p8), %s1045_s28, 4294966272  ;;  %p19_p5 = scmp.ge.s32.totalorder %s1609_s24, 5   ;;  %s2038_s18 = smov %s1540_s19 }
 0x38b   : > { %s2039_s19 = smov %s1544_s20  ;;  %s2040_s20 = smov %s1620_s27 }
 0x38c   : > { %s2041_s21 = smov %s1609_s24  ;;  %21 = sbr.rel (!%p19_p5) target bundleno = 5 (0x5), region = 88 }
 0x393   :  { %1050 = vsyncpa [#allocation3], 1 }
 0x394   :  { %1052 = vsyncpa [#allocation3 + $0x1], 1 }
 0x395   :  { %1053 = vsyncpa [#allocation5], 1 }
 0x396   :  { %1055 = vsyncpa [#allocation5 + $0x1], 1 }

</bundles_post_ra>
